<compile_context>
chip_gen: v5e
topology: v5e:2x2
jax: 0.10.0
libtpu: 0.0.40
codegen_flags: <defaults>
</compile_context>

<pallas_src>
import functools

import jax
import jax.numpy as jnp
from jax.experimental import pallas as pl
from jax.experimental.pallas import tpu as pltpu


def _first_aware_kernel(x_ref, w_ref, o_ref):
    # x_ref: (TB, TN) batch tile, w_ref: (1, TN) VMEM-resident weight tile.
    # (TB, TN) * (1, TN) broadcasts natively on the VPU.
    o_ref[...] = x_ref[...] * w_ref[...]


def _choose_tiles(B, FE, itemsize):
    """Pick (TB, TN): lane-dense last dim, large sublane-packed batch tile."""
    # Sublane packing factor: 8 for f32, 16 for bf16, 32 for int8/fp8.
    pack = max(8, 32 // itemsize)

    # Lane tile: full F*E when it fits comfortably (full-extent block is
    # always legal); otherwise a multiple of 128 (Pallas masks edge blocks).
    if FE <= 8192:
        tn = FE
    else:
        tn = 4096

    # Batch tile: largest packing-aligned tb such that one block is ~8 MiB.
    # With x-in, out double-buffered that is ~32 MiB of VMEM, which we cover
    # explicitly via vmem_limit_bytes (still well under v7x's 64 MiB phys).
    block_budget_bytes = 8 * 1024 * 1024
    tb = max(pack, block_budget_bytes // (tn * itemsize))
    tb = max(pack, (tb // pack) * pack)

    if tb >= B:
        tb = B  # full-extent block: always legal, even if B < pack

    # Guarantee >= 2 batch blocks on large batches so both v7x TensorCores
    # get work under dimension_semantics=("parallel", "parallel").
    if B >= 2 * pack and tb > (B + 1) // 2:
        half = (B + 1) // 2
        tb = max(pack, (half // pack) * pack)

    return tb, tn


@functools.partial(jax.jit, static_argnames=("force_pallas",))
def first_aware_branch(x, w, force_pallas=False):
    """x: (B, F, E), w: (F, E) -> (B, F*E).  Matches FirstAwareBranch.forward."""
    B, F, E = x.shape
    assert w.shape == (F, E)
    FE = F * E

    # KB-scale inputs: a pallas_call's fixed launch cost exceeds the work;
    # let XLA fuse the elementwise multiply instead.
    # TODO(synk): re-validate this crossover with a measured A/B (xprof min-of-N).
    if not force_pallas and B * FE < (1 << 20):
        return (x * w[None, :, :]).reshape(B, FE)

    # Flatten to a lane-dense 2D problem (row-major contiguous => free glue).
    x2 = x.reshape(B, FE)
    w2 = w.reshape(1, FE)

    itemsize = jnp.dtype(x.dtype).itemsize
    tb, tn = _choose_tiles(B, FE, itemsize)

    # Grid: FE blocks outer, batch blocks inner -> the (0, j) weight block
    # index is constant across consecutive steps (no repeated weight DMA).
    grid = (pl.cdiv(FE, tn), pl.cdiv(B, tb))

    # Explicit VMEM budget covering the double-buffered footprint
    # (2x x-in + 2x out + 2x weight blocks) plus headroom; 32-48 MiB fits all
    # of v5e/v6e (128 MiB physical) and v7x (64 MiB physical).
    footprint = 4 * tb * tn * itemsize + 4 * tn * itemsize
    vmem_limit = min(48 << 20, max(32 << 20, footprint + (4 << 20)))

    out = pl.pallas_call(
        _first_aware_kernel,
        out_shape=jax.ShapeDtypeStruct((B, FE), x.dtype),
        grid_spec=pltpu.PrefetchScalarGridSpec(
            num_scalar_prefetch=0,
            grid=grid,
            in_specs=[
                # batch tile of x
                pl.BlockSpec((tb, tn), lambda j, i: (i, j)),
                # weight tile: depends only on the outer axis -> VMEM-resident
                # across all inner (batch) steps.
                pl.BlockSpec((1, tn), lambda j, i: (0, j)),
            ],
            out_specs=pl.BlockSpec((tb, tn), lambda j, i: (i, j)),
        ),
        compiler_params=pltpu.CompilerParams(
            dimension_semantics=("parallel", "parallel"),
            vmem_limit_bytes=vmem_limit,
        ),
        cost_estimate=pl.CostEstimate(
            flops=B * FE,
            transcendentals=0,
            # x read once, out written once, weight fetched once per FE block.
            bytes_accessed=(2 * B * FE + FE) * itemsize,
        ),
    )(x2, w2)

    return out  # already (B, F*E), matching torch .reshape(B, -1)


if __name__ == "__main__":
    # Small shapes consistent with the module: batch=2, sparse_feat_num=4,
    # embedding_size=32  (F*E = 128 -> lane-dense last dim).
    B, SPARSE_FEAT_NUM, EMBEDDING_SIZE = 2, 4, 32

    key = jax.random.PRNGKey(0)
    k_x, k_w = jax.random.split(key)

    x = jax.random.normal(k_x, (B, SPARSE_FEAT_NUM, EMBEDDING_SIZE), jnp.float32)
    # deterministic parameter init: normal(mean=0, std=0.05), like nn.init.normal_
    W = 0.05 * jax.random.normal(k_w, (SPARSE_FEAT_NUM, EMBEDDING_SIZE), jnp.float32)

    # Force the Pallas path so the kernel itself is exercised once.
    y = first_aware_branch(x, W, force_pallas=True)
    y = jax.block_until_ready(y)

    # Default dispatch at this tiny size uses the fused XLA path.
    y_xla = jax.block_until_ready(first_aware_branch(x, W))

    # reference check in plain JAX
    y_ref = (x * W[None, :, :]).reshape(B, -1)
    assert y.shape == (B, SPARSE_FEAT_NUM * EMBEDDING_SIZE)
    assert jnp.allclose(y, y_ref, atol=1e-6, rtol=1e-6)
    assert jnp.allclose(y_xla, y_ref, atol=1e-6, rtol=1e-6)

    print("KERNEL_OK")
</pallas_src>

<mosaic_0001>
module attributes {stable_mosaic.version = 11 : i64} {
  func.func @_first_aware_kernel(%arg0: i32, %arg1: i32, %arg2: memref<2x128xf32, #tpu.memory_space<vmem>>, %arg3: memref<1x128xf32, #tpu.memory_space<vmem>>, %arg4: memref<2x128xf32, #tpu.memory_space<vmem>>) attributes {dimension_semantics = [#tpu.dimension_semantics<parallel>, #tpu.dimension_semantics<parallel>], iteration_bounds = array<i64: 1, 1>, scalar_prefetch = 0 : i64, scratch_operands = 0 : i64, tpu.core_type = #tpu.core_type<tc>, window_params = [{transform_indices = @transform_0, window_bounds = array<i64: 2, 128>}, {transform_indices = @transform_1, window_bounds = array<i64: 1, 128>}, {transform_indices = @transform_2, window_bounds = array<i64: 2, 128>}]} {
    %c0 = arith.constant 0 : index
    %c0_0 = arith.constant 0 : index
    %0 = vector.load %arg2[%c0, %c0_0] : memref<2x128xf32, #tpu.memory_space<vmem>>, vector<2x128xf32>
    %c0_1 = arith.constant 0 : index
    %c0_2 = arith.constant 0 : index
    %1 = vector.load %arg3[%c0_1, %c0_2] : memref<1x128xf32, #tpu.memory_space<vmem>>, vector<1x128xf32>
    %2 = vector.broadcast %1 : vector<1x128xf32> to vector<2x128xf32>
    %3 = arith.mulf %0, %2 : vector<2x128xf32>
    %c0_3 = arith.constant 0 : index
    %c0_4 = arith.constant 0 : index
    %4 = vector.load %arg4[%c0_3, %c0_4] : memref<2x128xf32, #tpu.memory_space<vmem>>, vector<2x128xf32>
    tpu.vector_store %arg4[%c0_3, %c0_4], %3 {strides = array<i32>} : memref<2x128xf32, #tpu.memory_space<vmem>>, vector<2x128xf32>,
    return
  }
  func.func @transform_0(%arg0: i32, %arg1: i32) -> (i32, i32) {
    %c0_i32 = arith.constant 0 : i32
    return %arg1, %arg0 : i32, i32
  }
  func.func @transform_1(%arg0: i32, %arg1: i32) -> (i32, i32) {
    %c0_i32 = arith.constant 0 : i32
    %c0_i32_0 = arith.constant 0 : i32
    return %c0_i32, %arg0 : i32, i32
  }
  func.func @transform_2(%arg0: i32, %arg1: i32) -> (i32, i32) {
    %c0_i32 = arith.constant 0 : i32
    return %arg1, %arg0 : i32, i32
  }
}

</mosaic_0001>

<bundles_post_ra>
// kernel: first_aware_branch.1
= control target key start
LH: loop header
LB: loop body
LE: loop exit
PB: predicated region body
PF: predicated region fallthrough
CT: control target
= control target key end

     0   :  { %s88_s0 = inlined_call_operand.vmem [shape: f32[2,128], index: 0, kind: input, shape index: {}]   ;;  %s89_s1 = inlined_call_operand.vmem [shape: f32[1,128], index: 1, kind: input, shape index: {}]   ;;  %s90_s2 = inlined_call_operand.hbm [shape: f32[2,128], index: 2, kind: output, shape index: {}]  }
   0x1   :  { %v12_v0 = vld [vmem:[%s88_s0] sm:$0x3] }
   0x2   :  { %v36_v1 = vld [vmem:[%s89_s1] ss:$0 sm:$0xff] }
   0x3   :  { %7 = vsyncpa [#allocation3], 0  ;;  %s26_s15 = sshll.u32 %s90_s2, 4  ;;  %v17_v2 = vmul.f32 %v36_v1, %v12_v0  ;;  %s63_s16 = smov [#allocation2]   ;;  %s27_s15 = int_to_ptr.hbm [resolvable:$true] %s26_s15 }
   0x4   :  { %s24_s17 = sshll.u32 %s63_s16, 4  ;;  %s25_s17 = int_to_ptr.vmem [resolvable:$true] %s24_s17 }
   0x5   :  { %18 = vst [vmem:[#allocation2] sm:$0x3] %v17_v2 }
   0x6   :  { %29 = dma.vmem_to_hbm [thread:$0]  %s25_s17, 32, %s27_s15, [#allocation3]  }
   0x7   :  { %61 = dma.done.wait [#allocation3], 32  }
   0x8   :  { %62 = vsyncadd [#allocation3], 4294967264 }
   0x9   :  { %34 = vsyncpa [#allocation3], 1 }

</bundles_post_ra>
